<compile_context>
chip_gen: v5e
topology: v5e:2x2
jax: 0.10.0
libtpu: 0.0.40
codegen_flags: <defaults>
</compile_context>

<pallas_src>
import functools

import jax
import jax.numpy as jnp
from jax.experimental import pallas as pl
from jax.experimental.pallas import tpu as pltpu


def _round_up(x, m):
    return ((x + m - 1) // m) * m


def a2c_kernel(obs_ref, params_ref, out_ref, *, dim_obs, num_act,
               off_w2, off_wh, off_b):
    """Single-invocation forward: obs -> [log_softmax(actor) | V | zero pad]."""
    num_out = num_act + 1
    C = params_ref.shape[1]

    obs = obs_ref[...]                                    # (B_pad, dim_obs)

    # ---- hidden layer 1 on the VPU: K = dim_obs rank-1 broadcast-FMAs ----
    w1 = params_ref[0:dim_obs, :]                         # (dim_obs, C)
    b1 = params_ref[off_b:off_b + 1, :]                   # (1, C)
    acc = obs[:, 0:1] * w1[0:1, :]
    for k in range(1, dim_obs):
        acc = acc + obs[:, k:k + 1] * w1[k:k + 1, :]
    h1 = jnp.maximum(acc + b1, 0.0)                       # (B_pad, C)

    # ---- hidden layer 2 on the MXU ----
    w2 = params_ref[off_w2:off_w2 + C, :]                 # (C, C), zero-padded
    b2 = params_ref[off_b + 1:off_b + 2, :]
    h2 = jnp.maximum(
        jnp.dot(h1, w2, preferred_element_type=jnp.float32) + b2, 0.0)

    # ---- fused actor+value head on the MXU ----
    wh = params_ref[off_wh:off_wh + C, :]                 # (C, C): [wa | wv | 0]
    bh = params_ref[off_b + 2:off_b + 3, :]
    head = jnp.dot(h2, wh, preferred_element_type=jnp.float32) + bh  # (B_pad, C)

    # ---- masked log-softmax over the actor columns, single full-slab store ----
    col = jax.lax.broadcasted_iota(jnp.int32, head.shape, 1)
    is_act = col < num_act
    m = jnp.max(jnp.where(is_act, head, -jnp.inf), axis=-1, keepdims=True)
    shifted = head - m
    lse = jnp.log(jnp.sum(jnp.exp(jnp.where(is_act, shifted, -jnp.inf)),
                          axis=-1, keepdims=True))
    # columns < num_act -> log-probs ; column num_act -> V ; rest stays padding
    out_ref[...] = jnp.where(is_act, shifted - lse, head)


def pack_params(params):
    """Pack (w1,b1,w2,b2,wa,ba,wv,bv) into one f32 blob (single DMA).

    Weights are stored (in_features, out_features); biases as (1, out) rows.
    Row layout (all weight blocks start on 8-row-aligned offsets):
      [0, dim_obs)          : w1
      [off_w2, off_w2 + C)  : w2   (zero-padded to C x C)
      [off_wh, off_wh + C)  : [wa | wv] fused head, zero-padded to C x C
      off_b, off_b+1, off_b+2 : b1, b2, [ba | bv] bias rows
    """
    w1, b1, w2, b2, wa, ba, wv, bv = params
    dim_obs, num_hid = w1.shape
    num_act = wa.shape[1]
    num_out = num_act + 1
    C = max(num_hid, num_out)

    off_w2 = _round_up(dim_obs, 8)
    off_wh = off_w2 + _round_up(C, 8)
    off_b = off_wh + _round_up(C, 8)
    rows = off_b + 3

    blob = jnp.zeros((rows, C), jnp.float32)
    blob = blob.at[0:dim_obs, 0:num_hid].set(w1)
    blob = blob.at[off_w2:off_w2 + num_hid, 0:num_hid].set(w2)
    w_head = jnp.concatenate([wa, wv], axis=1)            # (num_hid, num_out)
    blob = blob.at[off_wh:off_wh + num_hid, 0:num_out].set(w_head)
    blob = blob.at[off_b, 0:num_hid].set(b1[0])
    blob = blob.at[off_b + 1, 0:num_hid].set(b2[0])
    b_head = jnp.concatenate([ba, bv], axis=1)            # (1, num_out)
    blob = blob.at[off_b + 2, 0:num_out].set(b_head[0])
    return blob


def a2c_forward(obs, param_blob, *, num_act):
    """Equivalent of A2CPolicy.forward(obs, require='all') -> (log_prob, V_s)."""
    if obs.ndim == 1:
        obs = obs[None, :]
    B, dim_obs = obs.shape
    B_pad = max(8, _round_up(B, 8))                       # fill f32 sublanes
    if B_pad != B:
        obs = jnp.pad(obs, ((0, B_pad - B), (0, 0)))

    num_out = num_act + 1
    C = param_blob.shape[1]
    off_w2 = _round_up(dim_obs, 8)
    off_wh = off_w2 + _round_up(C, 8)
    off_b = off_wh + _round_up(C, 8)

    kernel = functools.partial(
        a2c_kernel, dim_obs=dim_obs, num_act=num_act,
        off_w2=off_w2, off_wh=off_wh, off_b=off_b)

    vmem = pl.BlockSpec(memory_space=pltpu.MemorySpace.VMEM)
    out = pl.pallas_call(
        kernel,
        out_shape=jax.ShapeDtypeStruct((B_pad, C), jnp.float32),
        in_specs=[vmem, vmem],
        out_specs=vmem,
    )(obs, param_blob)

    log_prob = out[:B, :num_act]
    v_s = out[:B, num_act:num_out]
    return log_prob, v_s


def init_params(key, dim_obs, num_act, num_hid):
    """PyTorch-style (uniform +-1/sqrt(fan_in)) init; weights stored (in, out)."""
    def linear(k, fan_in, fan_out):
        kw, kb = jax.random.split(k)
        bound = 1.0 / jnp.sqrt(jnp.float32(fan_in))
        w = jax.random.uniform(kw, (fan_in, fan_out), jnp.float32, -bound, bound)
        b = jax.random.uniform(kb, (1, fan_out), jnp.float32, -bound, bound)
        return w, b

    k1, k2, k3, k4 = jax.random.split(key, 4)
    w1, b1 = linear(k1, dim_obs, num_hid)
    w2, b2 = linear(k2, num_hid, num_hid)
    wa, ba = linear(k3, num_hid, num_act)
    wv, bv = linear(k4, num_hid, 1)
    return (w1, b1, w2, b2, wa, ba, wv, bv)


def a2c_forward_ref(obs, params):
    """Pure-JAX reference (unpacked params) for validation."""
    if obs.ndim == 1:
        obs = obs[None, :]
    w1, b1, w2, b2, wa, ba, wv, bv = params
    h1 = jnp.maximum(obs @ w1 + b1, 0.0)
    h2 = jnp.maximum(h1 @ w2 + b2, 0.0)
    logits = h2 @ wa + ba
    logp = jax.nn.log_softmax(logits, axis=1)
    v = h2 @ wv + bv
    return logp, v


if __name__ == "__main__":
    # CartPole-v1: dim_obs=4, num_act=2; small hidden size.
    dim_obs, num_act, num_hid, batch = 4, 2, 32, 2

    key = jax.random.PRNGKey(0)
    k_obs, k_par = jax.random.split(key)
    obs = jax.random.normal(k_obs, (batch, dim_obs), jnp.float32)
    params = init_params(k_par, dim_obs, num_act, num_hid)

    # Pack once (amortized across rollout steps), forward per step.
    param_blob = pack_params(params)
    fwd = jax.jit(a2c_forward, static_argnames=("num_act",))

    log_prob, v_s = fwd(obs, param_blob, num_act=num_act)
    jax.block_until_ready((log_prob, v_s))

    ref_logp, ref_v = a2c_forward_ref(obs, params)
    assert log_prob.shape == (batch, num_act) and v_s.shape == (batch, 1)
    assert jnp.allclose(log_prob, ref_logp, atol=1e-4, rtol=1e-4)
    assert jnp.allclose(v_s, ref_v, atol=1e-4, rtol=1e-4)

    # TODO(synk): select_act's Categorical sampling / env loop stay in host JAX;
    # only the forward pass is kernelized here.
    print("KERNEL_OK")
</pallas_src>

<mosaic_0001>
module attributes {stable_mosaic.version = 11 : i64} {
  func.func @a2c_kernel(%arg0: memref<8x4xf32, #tpu.memory_space<vmem>>, %arg1: memref<75x32xf32, #tpu.memory_space<vmem>>, %arg2: memref<8x32xf32, #tpu.memory_space<vmem>>) attributes {dimension_semantics = [], scalar_prefetch = 0 : i64, scratch_operands = 0 : i64, tpu.core_type = #tpu.core_type<tc>} {
    %c0 = arith.constant 0 : index
    %c0_0 = arith.constant 0 : index
    %0 = vector.load %arg0[%c0, %c0_0] : memref<8x4xf32, #tpu.memory_space<vmem>>, vector<8x4xf32>
    %c0_1 = arith.constant 0 : index
    %c0_2 = arith.constant 0 : index
    %1 = vector.load %arg1[%c0_1, %c0_2] : memref<75x32xf32, #tpu.memory_space<vmem>>, vector<4x32xf32>
    %c72 = arith.constant 72 : index
    %c0_3 = arith.constant 0 : index
    %2 = vector.load %arg1[%c72, %c0_3] : memref<75x32xf32, #tpu.memory_space<vmem>>, vector<1x32xf32>
    %3 = vector.extract_strided_slice %0 {offsets = [0, 0], sizes = [8, 1], strides = [1, 1]} : vector<8x4xf32> to vector<8x1xf32>
    %4 = vector.extract_strided_slice %1 {offsets = [0, 0], sizes = [1, 32], strides = [1, 1]} : vector<4x32xf32> to vector<1x32xf32>
    %5 = vector.broadcast %3 : vector<8x1xf32> to vector<8x32xf32>
    %6 = vector.broadcast %4 : vector<1x32xf32> to vector<8x32xf32>
    %7 = arith.mulf %5, %6 : vector<8x32xf32>
    %8 = vector.extract_strided_slice %0 {offsets = [0, 1], sizes = [8, 1], strides = [1, 1]} : vector<8x4xf32> to vector<8x1xf32>
    %9 = vector.extract_strided_slice %1 {offsets = [1, 0], sizes = [1, 32], strides = [1, 1]} : vector<4x32xf32> to vector<1x32xf32>
    %10 = vector.broadcast %8 : vector<8x1xf32> to vector<8x32xf32>
    %11 = vector.broadcast %9 : vector<1x32xf32> to vector<8x32xf32>
    %12 = arith.mulf %10, %11 : vector<8x32xf32>
    %13 = arith.addf %7, %12 : vector<8x32xf32>
    %14 = vector.extract_strided_slice %0 {offsets = [0, 2], sizes = [8, 1], strides = [1, 1]} : vector<8x4xf32> to vector<8x1xf32>
    %15 = vector.extract_strided_slice %1 {offsets = [2, 0], sizes = [1, 32], strides = [1, 1]} : vector<4x32xf32> to vector<1x32xf32>
    %16 = vector.broadcast %14 : vector<8x1xf32> to vector<8x32xf32>
    %17 = vector.broadcast %15 : vector<1x32xf32> to vector<8x32xf32>
    %18 = arith.mulf %16, %17 : vector<8x32xf32>
    %19 = arith.addf %13, %18 : vector<8x32xf32>
    %20 = vector.extract_strided_slice %0 {offsets = [0, 3], sizes = [8, 1], strides = [1, 1]} : vector<8x4xf32> to vector<8x1xf32>
    %21 = vector.extract_strided_slice %1 {offsets = [3, 0], sizes = [1, 32], strides = [1, 1]} : vector<4x32xf32> to vector<1x32xf32>
    %22 = vector.broadcast %20 : vector<8x1xf32> to vector<8x32xf32>
    %23 = vector.broadcast %21 : vector<1x32xf32> to vector<8x32xf32>
    %24 = arith.mulf %22, %23 : vector<8x32xf32>
    %25 = arith.addf %19, %24 : vector<8x32xf32>
    %26 = vector.broadcast %2 : vector<1x32xf32> to vector<8x32xf32>
    %27 = arith.addf %25, %26 : vector<8x32xf32>
    %cst = arith.constant 0.000000e+00 : f32
    %28 = vector.broadcast %cst : f32 to vector<8x32xf32>
    %29 = arith.maximumf %27, %28 : vector<8x32xf32>
    %c8 = arith.constant 8 : index
    %c0_4 = arith.constant 0 : index
    %30 = vector.load %arg1[%c8, %c0_4] : memref<75x32xf32, #tpu.memory_space<vmem>>, vector<32x32xf32>
    %c73 = arith.constant 73 : index
    %c0_5 = arith.constant 0 : index
    %31 = vector.load %arg1[%c73, %c0_5] : memref<75x32xf32, #tpu.memory_space<vmem>>, vector<1x32xf32>
    %cst_6 = arith.constant dense<0.000000e+00> : vector<8x32xf32>
    %32 = tpu.matmul %29, %30, %cst_6 {dimension_numbers = #tpu.dot_dimension_numbers<[1], [0], [0], [1], [0, 0, 1, 1], [], []>} : vector<8x32xf32>, vector<32x32xf32>, vector<8x32xf32> -> vector<8x32xf32>
    %33 = vector.broadcast %31 : vector<1x32xf32> to vector<8x32xf32>
    %34 = arith.addf %32, %33 : vector<8x32xf32>
    %cst_7 = arith.constant 0.000000e+00 : f32
    %35 = vector.broadcast %cst_7 : f32 to vector<8x32xf32>
    %36 = arith.maximumf %34, %35 : vector<8x32xf32>
    %c40 = arith.constant 40 : index
    %c0_8 = arith.constant 0 : index
    %37 = vector.load %arg1[%c40, %c0_8] : memref<75x32xf32, #tpu.memory_space<vmem>>, vector<32x32xf32>
    %c74 = arith.constant 74 : index
    %c0_9 = arith.constant 0 : index
    %38 = vector.load %arg1[%c74, %c0_9] : memref<75x32xf32, #tpu.memory_space<vmem>>, vector<1x32xf32>
    %cst_10 = arith.constant dense<0.000000e+00> : vector<8x32xf32>
    %39 = tpu.matmul %36, %37, %cst_10 {dimension_numbers = #tpu.dot_dimension_numbers<[1], [0], [0], [1], [0, 0, 1, 1], [], []>} : vector<8x32xf32>, vector<32x32xf32>, vector<8x32xf32> -> vector<8x32xf32>
    %40 = vector.broadcast %38 : vector<1x32xf32> to vector<8x32xf32>
    %41 = arith.addf %39, %40 : vector<8x32xf32>
    %42 = tpu.iota {dimensions = array<i32: 1>} : vector<8x32xi32>
    %c2_i32 = arith.constant 2 : i32
    %43 = vector.broadcast %c2_i32 : i32 to vector<8x32xi32>
    %44 = arith.cmpi slt, %42, %43 : vector<8x32xi32>
    %cst_11 = arith.constant 0xFF800000 : f32
    %45 = vector.broadcast %cst_11 : f32 to vector<8x32xf32>
    %46 = arith.select %44, %41, %45 : vector<8x32xi1>, vector<8x32xf32>
    %cst_12 = arith.constant dense<0xFF800000> : vector<8xf32>
    %47 = vector.multi_reduction <maximumf>, %46, %cst_12 [1] : vector<8x32xf32> to vector<8xf32>
    %48 = vector.shape_cast %47 : vector<8xf32> to vector<8x1xf32>
    %49 = vector.broadcast %48 : vector<8x1xf32> to vector<8x32xf32>
    %50 = arith.subf %41, %49 : vector<8x32xf32>
    %cst_13 = arith.constant 0xFF800000 : f32
    %51 = vector.broadcast %cst_13 : f32 to vector<8x32xf32>
    %52 = arith.select %44, %50, %51 : vector<8x32xi1>, vector<8x32xf32>
    %53 = math.exp %52 : vector<8x32xf32>
    %cst_14 = arith.constant dense<0.000000e+00> : vector<8xf32>
    %54 = vector.multi_reduction <add>, %53, %cst_14 [1] : vector<8x32xf32> to vector<8xf32>
    %55 = vector.shape_cast %54 : vector<8xf32> to vector<8x1xf32>
    %56 = math.log %55 : vector<8x1xf32>
    %57 = vector.broadcast %56 : vector<8x1xf32> to vector<8x32xf32>
    %58 = arith.subf %50, %57 : vector<8x32xf32>
    %59 = arith.select %44, %58, %41 : vector<8x32xi1>, vector<8x32xf32>
    %c0_15 = arith.constant 0 : index
    %c0_16 = arith.constant 0 : index
    %60 = vector.load %arg2[%c0_15, %c0_16] : memref<8x32xf32, #tpu.memory_space<vmem>>, vector<8x32xf32>
    tpu.vector_store %arg2[%c0_15, %c0_16], %59 {strides = array<i32>} : memref<8x32xf32, #tpu.memory_space<vmem>>, vector<8x32xf32>,
    return
  }
}

</mosaic_0001>

<bundles_post_ra>
// kernel: a2c_forward.1
= control target key start
LH: loop header
LB: loop body
LE: loop exit
PB: predicated region body
PF: predicated region fallthrough
CT: control target
= control target key end

     0   :  { %v146_v0 = vmov 0   ;;  %v147_v2 = vmov 2   ;;  %v148_v3 = vmov 1   ;;  %v149_v4 = vmov 3   ;;  %s215_s0 = inlined_call_operand.vmem [shape: f32[8,4], index: 0, kind: input, shape index: {}]   ;;  %s216_s1 = inlined_call_operand.vmem [shape: f32[75,32], index: 1, kind: input, shape index: {}]   ;;  %s217_s2 = inlined_call_operand.vmem [shape: f32[8,32], index: 2, kind: output, shape index: {}]  }
   0x1   :  { %134 = vset.pattern.permute.xlu0 %v146_v0  ;;  %v11_v1 = vld [vmem:[%s215_s0] sm:$0xff]  ;;  %136 = vset.pattern.permute.xlu1 %v147_v2  ;;  %v47_v6 = vld [vmem:[%s216_s1 + $0x18] sm:$0xff]  ;;  %v46_v7 = vld [vmem:[%s216_s1 + $0x10] sm:$0xff]  ;;  %vm51_vm0 = vcmask 261120   ;;  %v105_v36 = vlaneseq }
   0x2   :  { %16 = vperm.xlu0 %134, %v11_v1   ;;  %29 = vperm.xlu1 %136, %v11_v1   ;;  %v48_v5 = vld [vmem:[%s216_s1 + $0x20] sm:$0xff]  ;;  %v45_v8 = vld [vmem:[%s216_s1 + $0x8] sm:$0xff]  ;;  %v78_v29 = vld [vmem:[%s216_s1 + $0x38] sm:$0xff] }
   0x3   :  { %67 = vmatpush.msra.mxu0 %v48_v5  ;;  %v79_v9 = vld [vmem:[%s216_s1 + $0x40] sm:$0xff]  ;;  %v139_v25 = vld [vmem:[%s216_s1 + $0x48] ss:$0 sm:$0xff]  ;;  %v77_v30 = vld [vmem:[%s216_s1 + $0x30] sm:$0xff]  ;;  %v106_v37 = vand.u32 127, %v105_v36 }
   0x4   :  { %97 = vmatpush.msra.mxu1 %v79_v9  ;;  %v12_v12 = vld [vmem:[%s216_s1] sm:$0xf]  ;;  %v76_v31 = vld [vmem:[%s216_s1 + $0x28] sm:$0xff] }
   0x5   :  { %68 = vmatpush.msra.mxu0 %v47_v6  ;;  %v19_v13 = vperm.slane %v12_v12, 0  ;;  %v25_v14 = vperm.slane %v12_v12, 1  ;;  %v32_v15 = vperm.slane %v12_v12, 2  ;;  %v39_v16 = vperm.slane %v12_v12, 3  ;;  %v140_v32 = vld [vmem:[%s216_s1 + $0x49] ss:$0 sm:$0xff] }
   0x6   :  { %98 = vmatpush.msra.mxu1 %v78_v29  ;;  %v141_v38 = vld [vmem:[%s216_s1 + $0x4a] ss:$0 sm:$0xff]  ;;  %vm107_vm1 = vcmp.lt.s32.totalorder %v106_v37, 2 }
   0x7   :  { %69 = vmatpush.msra.mxu0 %v46_v7 }
   0x8   :  { %99 = vmatpush.msra.mxu1 %v77_v30 }
   0x9   :  { %70 = vmatpush.msra.mxu0 %v45_v8 }
   0xa   :  { %135 = vset.pattern.permute.xlu0 %v148_v3  ;;  %137 = vset.pattern.permute.xlu1 %v149_v4 }
   0xb   :  { %22 = vperm.xlu0 %135, %v11_v1   ;;  %36 = vperm.xlu1 %137, %v11_v1  }
   0xc   :  { %100 = vmatpush.msra.mxu1 %v76_v31 }
  0x13   :  { %138 = vset.pattern.permute.xlu0 %v149_v4 }
  0x74   :  { %v17_v10 = vpop.permute.xlu0 %16  ;;  %v30_v11 = vpop.permute.xlu1 %29 }
  0x75   :  { %v20_v19 = vmul.f32 %v19_v13, %v17_v10  ;;  %v33_v21 = vmul.f32 %v32_v15, %v30_v11 }
  0x7d   :  { %v23_v17 = vpop.permute.xlu0 %22  ;;  %v37_v18 = vpop.permute.xlu1 %36 }
  0x7e   :  { %v26_v20 = vmul.f32 %v25_v14, %v23_v17  ;;  %v40_v23 = vmul.f32 %v39_v16, %v37_v18 }
  0x80   :  { %v27_v22 = vadd.f32 %v26_v20, %v20_v19 }
  0x82   :  { %v34_v24 = vadd.f32 %v33_v21, %v27_v22 }
  0x84   :  { %v41_v26 = vadd.f32 %v40_v23, %v34_v24 }
  0x86   :  { %v43_v27 = vadd.f32 %v139_v25, %v41_v26 }
  0x88   :  { %v44_v28 = vmax.f32 %v43_v27, 0.0 }
  0x8a   :  { %128 = vmatmul.msk.f32.vlgmr.msra.gmra.mxu0 %vm51_vm0, %v44_v28 }
 0x107   :  { %v72_v33 = vpop.f32.mrf.mxu0 }
 0x108   :  { %v73_v34 = vadd.f32 %v140_v32, %v72_v33 }
 0x10a   :  { %v75_v35 = vmax.f32 %v73_v34, 0.0 }
 0x10c   :  { %129 = vmatmul.msk.f32.vlgmr.msra.gmra.mxu1 %vm51_vm0, %v75_v35 }
 0x189   :  { %v102_v39 = vpop.f32.mrf.mxu1 }
 0x18a   :  { %v103_v40 = vadd.f32 %v141_v38, %v102_v39 }
 0x18c   :  { %v108_v41 = vsel %vm107_vm1, %v103_v40, -inf }
 0x18d   :  { %v109_v42 = vsel %vm51_vm0, %v108_v41, -inf }
 0x18e   :  { %110 = vmax.xlane.f32.xlu2 %v109_v42 }
 0x201   :  { %v111_v43 = vpop.xlane.xlu2 %110 }
 0x202   :  { %v112_v44 = vsub.f32 %v103_v40, %v111_v43 }
 0x204   :  { %v113_v45 = vsel %vm107_vm1, %v112_v44, -inf }
 0x205   :  { %v114_v46 = vmul.f32 1.442695, %v113_v45 }
 0x207   :  { %142 = vpow2.f32 %v114_v46 }
 0x20d   :  { %v143_v47 = vpop.eup %142 }
 0x20e   :  { %v116_v48 = vsel %vm51_vm0, %v143_v47, 0.0 }
 0x20f   :  { %117 = vadd.xlane.f32.xlu2 %v116_v48 }
 0x282   :  { %v118_v49 = vpop.xlane.xlu2 %117 }
 0x283   :  { %144 = vlog2.f32 %v118_v49 }
 0x289   :  { %v145_v50 = vpop.eup %144 }
 0x28a   :  { %v120_v51 = vmul.f32 0.6931472, %v145_v50 }
 0x28c   :  { %v121_v52 = vsub.f32 %v112_v44, %v120_v51 }
 0x28e   :  { %v122_v53 = vsel %vm107_vm1, %v121_v52, %v103_v40 }
 0x28f   :  { %123 = vst.msk [vmem:[%s217_s2] sm:$0xff] %vm51_vm0, %v122_v53 }

</bundles_post_ra>
